<compile_context>
chip_gen: v7x
topology: tpu7x:2x2x1
jax: 0.10.0
libtpu: 0.0.40
codegen_flags: <defaults>
</compile_context>

<pallas_src>
import jax
import jax.numpy as jnp
from jax import lax
from jax.experimental import pallas as pl
from jax.experimental.pallas import tpu as pltpu


TOK_TILE = 128   # tokens per grid step (one lane width)
VCHUNK = 32      # vocab entries per inner-loop chunk (sublane axis)


# ---------------------------------------------------------------------------
# Deterministic string -> int32 key hashing (host-side glue; replaces the
# string-keyed ScriptVocabulary dictionary).
# ---------------------------------------------------------------------------
def fnv1a_32(s: str) -> int:
    h = 2166136261
    for b in s.encode("utf-8"):
        h ^= b
        h = (h * 16777619) & 0xFFFFFFFF
    return h & 0x7FFFFFFF  # non-negative so it fits int32 cleanly


# ---------------------------------------------------------------------------
# Pallas kernel: vocabulary lookup (key -> index, unk fallback).
# ---------------------------------------------------------------------------
def make_vocab_lookup_kernel(unk_idx: int, v_pad: int):
    n_chunks = v_pad // VCHUNK

    def kernel(tok_ref, vocab_ref, out_ref):
        # tok_ref:   (1, TOK_TILE)  hashed token keys, tokens on the lane axis
        # vocab_ref: (v_pad, 1)     hashed vocab keys, entries on the sublane axis
        # out_ref:   (1, TOK_TILE)  vocab indices (lane-dense output)
        toks = tok_ref[...]

        # Hoisted (loop-invariant) broadcasts.
        toks_b = jnp.broadcast_to(toks, (VCHUNK, TOK_TILE))
        sub_iota = lax.broadcasted_iota(jnp.int32, (VCHUNK, TOK_TILE), 0)

        def body(c, running):
            off = pl.multiple_of(c * VCHUNK, VCHUNK)
            vcol = vocab_ref[pl.ds(off, VCHUNK), :]          # (VCHUNK, 1)
            eq = vcol == toks_b                              # (VCHUNK, TOK_TILE)
            cand = jnp.where(eq, sub_iota + off, jnp.int32(-1))
            return jnp.maximum(running, cand)                # VPU running max

        running = lax.fori_loop(
            0, n_chunks, body,
            jnp.full((VCHUNK, TOK_TILE), -1, dtype=jnp.int32),
            unroll=True if n_chunks <= 32 else 8)

        # Single cross-sublane (XLU) reduce.  Duplicate keys resolve to the
        # largest index ("last wins"), matching the host reference dict.
        matched = jnp.max(running, axis=0, keepdims=True)    # (1, TOK_TILE)
        out_ref[...] = jnp.where(matched >= 0, matched, jnp.int32(unk_idx))

    return kernel


def vocab_transform(token_keys, vocab_keys, start_ids, end_ids, unk_idx):
    """token_keys: (N,) int32 hashed tokens; vocab_keys: (V,) int32 hashed
    vocab keys (non-negative); start_ids/end_ids: (N,) int32 pass-through."""
    n = int(token_keys.shape[0])
    v = int(vocab_keys.shape[0])

    # Pad tokens to a multiple of TOK_TILE (pad key -2 never matches any
    # non-negative vocab key; padded results are trimmed below).  Pad the
    # vocab to a multiple of VCHUNK with a -1 sentinel (never matches a
    # non-negative token key).
    n_pad = max(TOK_TILE, ((n + TOK_TILE - 1) // TOK_TILE) * TOK_TILE)
    v_pad = ((v + VCHUNK - 1) // VCHUNK) * VCHUNK

    tok2d = jnp.full((1, n_pad), -2, dtype=jnp.int32).at[0, :n].set(
        token_keys.astype(jnp.int32))
    vocab2d = jnp.full((v_pad, 1), -1, dtype=jnp.int32).at[:v, 0].set(
        vocab_keys.astype(jnp.int32))

    kernel = make_vocab_lookup_kernel(int(unk_idx), v_pad)

    token_ids = pl.pallas_call(
        kernel,
        out_shape=jax.ShapeDtypeStruct((1, n_pad), jnp.int32),
        grid=(n_pad // TOK_TILE,),
        in_specs=[
            pl.BlockSpec((1, TOK_TILE), lambda i: (0, i)),   # token tile
            pl.BlockSpec((v_pad, 1), lambda i: (0, 0)),      # whole vocab, constant
        ],
        out_specs=pl.BlockSpec((1, TOK_TILE), lambda i: (0, i)),
        compiler_params=pltpu.CompilerParams(
            # Token tiles are independent -> shard across v7x's 2 TensorCores.
            dimension_semantics=("parallel",)),
    )(tok2d, vocab2d)

    # start_ids / end_ids are identity in the original module: return the
    # inputs directly (no kernel DMA, no extra output buffers).
    # TODO(synk): torch.long (int64) is narrowed to int32 — TPU vector units
    # have no native int64; values are small indices so this is safe.
    return {
        "token_ids": token_ids[0, :n],
        "start_ids": jnp.asarray(start_ids, dtype=jnp.int32),
        "end_ids": jnp.asarray(end_ids, dtype=jnp.int32),
    }


if __name__ == "__main__":
    # --- deterministic synthetic vocabulary (stands in for Vocabulary) ---
    V = 512
    vocab_tokens = ["<pad>", "<unk>", "<bos>", "<eos>"] + [
        f"word{i}" for i in range(V - 4)
    ]
    pad_idx, unk_idx, bos_idx, eos_idx = 0, 1, 2, 3
    vocab_keys_host = [fnv1a_32(t) for t in vocab_tokens]

    # --- synthetic Tokens input ---
    token_texts = ["<bos>", "word7", "word42", "notinvocab", "word511x",
                   "word100", "<eos>"]
    n_tokens = len(token_texts)
    start_ids_host = [i * 5 for i in range(n_tokens)]
    end_ids_host = [i * 5 + 4 for i in range(n_tokens)]

    # deterministic key just to satisfy "construct with PRNGKey(0)"; inputs
    # above are already deterministic.
    _ = jax.random.PRNGKey(0)

    token_keys = jnp.asarray([fnv1a_32(t) for t in token_texts],
                             dtype=jnp.int32)
    vocab_keys = jnp.asarray(vocab_keys_host, dtype=jnp.int32)
    start_ids = jnp.asarray(start_ids_host, dtype=jnp.int32)
    end_ids = jnp.asarray(end_ids_host, dtype=jnp.int32)

    out = vocab_transform(token_keys, vocab_keys, start_ids, end_ids, unk_idx)
    out = jax.tree_util.tree_map(jax.block_until_ready, out)

    # --- reference check (host vocab lookup semantics) ---
    key_to_idx = {k: i for i, k in enumerate(vocab_keys_host)}
    ref_token_ids = [key_to_idx.get(fnv1a_32(t), unk_idx) for t in token_texts]

    got_token_ids = [int(x) for x in out["token_ids"]]
    got_start = [int(x) for x in out["start_ids"]]
    got_end = [int(x) for x in out["end_ids"]]

    assert got_token_ids == ref_token_ids, (got_token_ids, ref_token_ids)
    assert got_start == start_ids_host
    assert got_end == end_ids_host
    # TODO(synk): string tokenization / ScriptVocabulary string dict has no
    # TPU equivalent; it is replaced by deterministic host-side FNV-1a hashing.
    print("KERNEL_OK")
</pallas_src>

<mosaic_0001>
module attributes {stable_mosaic.version = 11 : i64} {
  func.func @kernel(%arg0: i32, %arg1: memref<1x128xi32, #tpu.memory_space<vmem>>, %arg2: memref<512x1xi32, #tpu.memory_space<vmem>>, %arg3: memref<1x128xi32, #tpu.memory_space<vmem>>) attributes {dimension_semantics = [#tpu.dimension_semantics<parallel>], iteration_bounds = array<i64: 1>, scalar_prefetch = 0 : i64, scratch_operands = 0 : i64, tpu.core_type = #tpu.core_type<tc>, window_params = [{transform_indices = @transform_0, window_bounds = array<i64: 1, 128>}, {pipeline_mode = #tpu.pipeline_mode<synchronous>, transform_indices = @transform_1, window_bounds = array<i64: 512, 1>}, {transform_indices = @transform_2, window_bounds = array<i64: 1, 128>}]} {
    %c0 = arith.constant 0 : index
    %c0_0 = arith.constant 0 : index
    %0 = vector.load %arg1[%c0, %c0_0] : memref<1x128xi32, #tpu.memory_space<vmem>>, vector<1x128xi32>
    %1 = vector.shape_cast %0 : vector<1x128xi32> to vector<1x128xi32>
    %2 = vector.broadcast %1 : vector<1x128xi32> to vector<32x128xi32>
    %3 = tpu.iota {dimensions = array<i32: 0>} : vector<32x128xi32>
    %c-1_i32 = arith.constant -1 : i32
    %4 = vector.broadcast %c-1_i32 : i32 to vector<32x128xi32>
    %c0_i32 = arith.constant 0 : i32
    %c32_i32 = arith.constant 32 : i32
    %5 = arith.muli %c0_i32, %c32_i32 : i32
    %6 = tpu.assume_multiple %5, 32 : i32
    %7 = arith.index_cast %6 : i32 to index
    %c0_1 = arith.constant 0 : index
    %8 = vector.load %arg2[%7, %c0_1] : memref<512x1xi32, #tpu.memory_space<vmem>>, vector<32x1xi32>
    %9 = vector.broadcast %8 : vector<32x1xi32> to vector<32x128xi32>
    %10 = arith.cmpi eq, %9, %2 : vector<32x128xi32>
    %11 = vector.broadcast %6 : i32 to vector<32x128xi32>
    %12 = arith.addi %3, %11 : vector<32x128xi32>
    %c-1_i32_2 = arith.constant -1 : i32
    %13 = vector.broadcast %c-1_i32_2 : i32 to vector<32x128xi32>
    %14 = arith.select %10, %12, %13 : vector<32x128xi1>, vector<32x128xi32>
    %15 = arith.maxsi %4, %14 : vector<32x128xi32>
    %c1_i32 = arith.constant 1 : i32
    %c32_i32_3 = arith.constant 32 : i32
    %16 = arith.muli %c1_i32, %c32_i32_3 : i32
    %17 = tpu.assume_multiple %16, 32 : i32
    %18 = arith.index_cast %17 : i32 to index
    %c0_4 = arith.constant 0 : index
    %19 = vector.load %arg2[%18, %c0_4] : memref<512x1xi32, #tpu.memory_space<vmem>>, vector<32x1xi32>
    %20 = vector.broadcast %19 : vector<32x1xi32> to vector<32x128xi32>
    %21 = arith.cmpi eq, %20, %2 : vector<32x128xi32>
    %22 = vector.broadcast %17 : i32 to vector<32x128xi32>
    %23 = arith.addi %3, %22 : vector<32x128xi32>
    %c-1_i32_5 = arith.constant -1 : i32
    %24 = vector.broadcast %c-1_i32_5 : i32 to vector<32x128xi32>
    %25 = arith.select %21, %23, %24 : vector<32x128xi1>, vector<32x128xi32>
    %26 = arith.maxsi %15, %25 : vector<32x128xi32>
    %c2_i32 = arith.constant 2 : i32
    %c32_i32_6 = arith.constant 32 : i32
    %27 = arith.muli %c2_i32, %c32_i32_6 : i32
    %28 = tpu.assume_multiple %27, 32 : i32
    %29 = arith.index_cast %28 : i32 to index
    %c0_7 = arith.constant 0 : index
    %30 = vector.load %arg2[%29, %c0_7] : memref<512x1xi32, #tpu.memory_space<vmem>>, vector<32x1xi32>
    %31 = vector.broadcast %30 : vector<32x1xi32> to vector<32x128xi32>
    %32 = arith.cmpi eq, %31, %2 : vector<32x128xi32>
    %33 = vector.broadcast %28 : i32 to vector<32x128xi32>
    %34 = arith.addi %3, %33 : vector<32x128xi32>
    %c-1_i32_8 = arith.constant -1 : i32
    %35 = vector.broadcast %c-1_i32_8 : i32 to vector<32x128xi32>
    %36 = arith.select %32, %34, %35 : vector<32x128xi1>, vector<32x128xi32>
    %37 = arith.maxsi %26, %36 : vector<32x128xi32>
    %c3_i32 = arith.constant 3 : i32
    %c32_i32_9 = arith.constant 32 : i32
    %38 = arith.muli %c3_i32, %c32_i32_9 : i32
    %39 = tpu.assume_multiple %38, 32 : i32
    %40 = arith.index_cast %39 : i32 to index
    %c0_10 = arith.constant 0 : index
    %41 = vector.load %arg2[%40, %c0_10] : memref<512x1xi32, #tpu.memory_space<vmem>>, vector<32x1xi32>
    %42 = vector.broadcast %41 : vector<32x1xi32> to vector<32x128xi32>
    %43 = arith.cmpi eq, %42, %2 : vector<32x128xi32>
    %44 = vector.broadcast %39 : i32 to vector<32x128xi32>
    %45 = arith.addi %3, %44 : vector<32x128xi32>
    %c-1_i32_11 = arith.constant -1 : i32
    %46 = vector.broadcast %c-1_i32_11 : i32 to vector<32x128xi32>
    %47 = arith.select %43, %45, %46 : vector<32x128xi1>, vector<32x128xi32>
    %48 = arith.maxsi %37, %47 : vector<32x128xi32>
    %c4_i32 = arith.constant 4 : i32
    %c32_i32_12 = arith.constant 32 : i32
    %49 = arith.muli %c4_i32, %c32_i32_12 : i32
    %50 = tpu.assume_multiple %49, 32 : i32
    %51 = arith.index_cast %50 : i32 to index
    %c0_13 = arith.constant 0 : index
    %52 = vector.load %arg2[%51, %c0_13] : memref<512x1xi32, #tpu.memory_space<vmem>>, vector<32x1xi32>
    %53 = vector.broadcast %52 : vector<32x1xi32> to vector<32x128xi32>
    %54 = arith.cmpi eq, %53, %2 : vector<32x128xi32>
    %55 = vector.broadcast %50 : i32 to vector<32x128xi32>
    %56 = arith.addi %3, %55 : vector<32x128xi32>
    %c-1_i32_14 = arith.constant -1 : i32
    %57 = vector.broadcast %c-1_i32_14 : i32 to vector<32x128xi32>
    %58 = arith.select %54, %56, %57 : vector<32x128xi1>, vector<32x128xi32>
    %59 = arith.maxsi %48, %58 : vector<32x128xi32>
    %c5_i32 = arith.constant 5 : i32
    %c32_i32_15 = arith.constant 32 : i32
    %60 = arith.muli %c5_i32, %c32_i32_15 : i32
    %61 = tpu.assume_multiple %60, 32 : i32
    %62 = arith.index_cast %61 : i32 to index
    %c0_16 = arith.constant 0 : index
    %63 = vector.load %arg2[%62, %c0_16] : memref<512x1xi32, #tpu.memory_space<vmem>>, vector<32x1xi32>
    %64 = vector.broadcast %63 : vector<32x1xi32> to vector<32x128xi32>
    %65 = arith.cmpi eq, %64, %2 : vector<32x128xi32>
    %66 = vector.broadcast %61 : i32 to vector<32x128xi32>
    %67 = arith.addi %3, %66 : vector<32x128xi32>
    %c-1_i32_17 = arith.constant -1 : i32
    %68 = vector.broadcast %c-1_i32_17 : i32 to vector<32x128xi32>
    %69 = arith.select %65, %67, %68 : vector<32x128xi1>, vector<32x128xi32>
    %70 = arith.maxsi %59, %69 : vector<32x128xi32>
    %c6_i32 = arith.constant 6 : i32
    %c32_i32_18 = arith.constant 32 : i32
    %71 = arith.muli %c6_i32, %c32_i32_18 : i32
    %72 = tpu.assume_multiple %71, 32 : i32
    %73 = arith.index_cast %72 : i32 to index
    %c0_19 = arith.constant 0 : index
    %74 = vector.load %arg2[%73, %c0_19] : memref<512x1xi32, #tpu.memory_space<vmem>>, vector<32x1xi32>
    %75 = vector.broadcast %74 : vector<32x1xi32> to vector<32x128xi32>
    %76 = arith.cmpi eq, %75, %2 : vector<32x128xi32>
    %77 = vector.broadcast %72 : i32 to vector<32x128xi32>
    %78 = arith.addi %3, %77 : vector<32x128xi32>
    %c-1_i32_20 = arith.constant -1 : i32
    %79 = vector.broadcast %c-1_i32_20 : i32 to vector<32x128xi32>
    %80 = arith.select %76, %78, %79 : vector<32x128xi1>, vector<32x128xi32>
    %81 = arith.maxsi %70, %80 : vector<32x128xi32>
    %c7_i32 = arith.constant 7 : i32
    %c32_i32_21 = arith.constant 32 : i32
    %82 = arith.muli %c7_i32, %c32_i32_21 : i32
    %83 = tpu.assume_multiple %82, 32 : i32
    %84 = arith.index_cast %83 : i32 to index
    %c0_22 = arith.constant 0 : index
    %85 = vector.load %arg2[%84, %c0_22] : memref<512x1xi32, #tpu.memory_space<vmem>>, vector<32x1xi32>
    %86 = vector.broadcast %85 : vector<32x1xi32> to vector<32x128xi32>
    %87 = arith.cmpi eq, %86, %2 : vector<32x128xi32>
    %88 = vector.broadcast %83 : i32 to vector<32x128xi32>
    %89 = arith.addi %3, %88 : vector<32x128xi32>
    %c-1_i32_23 = arith.constant -1 : i32
    %90 = vector.broadcast %c-1_i32_23 : i32 to vector<32x128xi32>
    %91 = arith.select %87, %89, %90 : vector<32x128xi1>, vector<32x128xi32>
    %92 = arith.maxsi %81, %91 : vector<32x128xi32>
    %c8_i32 = arith.constant 8 : i32
    %c32_i32_24 = arith.constant 32 : i32
    %93 = arith.muli %c8_i32, %c32_i32_24 : i32
    %94 = tpu.assume_multiple %93, 32 : i32
    %95 = arith.index_cast %94 : i32 to index
    %c0_25 = arith.constant 0 : index
    %96 = vector.load %arg2[%95, %c0_25] : memref<512x1xi32, #tpu.memory_space<vmem>>, vector<32x1xi32>
    %97 = vector.broadcast %96 : vector<32x1xi32> to vector<32x128xi32>
    %98 = arith.cmpi eq, %97, %2 : vector<32x128xi32>
    %99 = vector.broadcast %94 : i32 to vector<32x128xi32>
    %100 = arith.addi %3, %99 : vector<32x128xi32>
    %c-1_i32_26 = arith.constant -1 : i32
    %101 = vector.broadcast %c-1_i32_26 : i32 to vector<32x128xi32>
    %102 = arith.select %98, %100, %101 : vector<32x128xi1>, vector<32x128xi32>
    %103 = arith.maxsi %92, %102 : vector<32x128xi32>
    %c9_i32 = arith.constant 9 : i32
    %c32_i32_27 = arith.constant 32 : i32
    %104 = arith.muli %c9_i32, %c32_i32_27 : i32
    %105 = tpu.assume_multiple %104, 32 : i32
    %106 = arith.index_cast %105 : i32 to index
    %c0_28 = arith.constant 0 : index
    %107 = vector.load %arg2[%106, %c0_28] : memref<512x1xi32, #tpu.memory_space<vmem>>, vector<32x1xi32>
    %108 = vector.broadcast %107 : vector<32x1xi32> to vector<32x128xi32>
    %109 = arith.cmpi eq, %108, %2 : vector<32x128xi32>
    %110 = vector.broadcast %105 : i32 to vector<32x128xi32>
    %111 = arith.addi %3, %110 : vector<32x128xi32>
    %c-1_i32_29 = arith.constant -1 : i32
    %112 = vector.broadcast %c-1_i32_29 : i32 to vector<32x128xi32>
    %113 = arith.select %109, %111, %112 : vector<32x128xi1>, vector<32x128xi32>
    %114 = arith.maxsi %103, %113 : vector<32x128xi32>
    %c10_i32 = arith.constant 10 : i32
    %c32_i32_30 = arith.constant 32 : i32
    %115 = arith.muli %c10_i32, %c32_i32_30 : i32
    %116 = tpu.assume_multiple %115, 32 : i32
    %117 = arith.index_cast %116 : i32 to index
    %c0_31 = arith.constant 0 : index
    %118 = vector.load %arg2[%117, %c0_31] : memref<512x1xi32, #tpu.memory_space<vmem>>, vector<32x1xi32>
    %119 = vector.broadcast %118 : vector<32x1xi32> to vector<32x128xi32>
    %120 = arith.cmpi eq, %119, %2 : vector<32x128xi32>
    %121 = vector.broadcast %116 : i32 to vector<32x128xi32>
    %122 = arith.addi %3, %121 : vector<32x128xi32>
    %c-1_i32_32 = arith.constant -1 : i32
    %123 = vector.broadcast %c-1_i32_32 : i32 to vector<32x128xi32>
    %124 = arith.select %120, %122, %123 : vector<32x128xi1>, vector<32x128xi32>
    %125 = arith.maxsi %114, %124 : vector<32x128xi32>
    %c11_i32 = arith.constant 11 : i32
    %c32_i32_33 = arith.constant 32 : i32
    %126 = arith.muli %c11_i32, %c32_i32_33 : i32
    %127 = tpu.assume_multiple %126, 32 : i32
    %128 = arith.index_cast %127 : i32 to index
    %c0_34 = arith.constant 0 : index
    %129 = vector.load %arg2[%128, %c0_34] : memref<512x1xi32, #tpu.memory_space<vmem>>, vector<32x1xi32>
    %130 = vector.broadcast %129 : vector<32x1xi32> to vector<32x128xi32>
    %131 = arith.cmpi eq, %130, %2 : vector<32x128xi32>
    %132 = vector.broadcast %127 : i32 to vector<32x128xi32>
    %133 = arith.addi %3, %132 : vector<32x128xi32>
    %c-1_i32_35 = arith.constant -1 : i32
    %134 = vector.broadcast %c-1_i32_35 : i32 to vector<32x128xi32>
    %135 = arith.select %131, %133, %134 : vector<32x128xi1>, vector<32x128xi32>
    %136 = arith.maxsi %125, %135 : vector<32x128xi32>
    %c12_i32 = arith.constant 12 : i32
    %c32_i32_36 = arith.constant 32 : i32
    %137 = arith.muli %c12_i32, %c32_i32_36 : i32
    %138 = tpu.assume_multiple %137, 32 : i32
    %139 = arith.index_cast %138 : i32 to index
    %c0_37 = arith.constant 0 : index
    %140 = vector.load %arg2[%139, %c0_37] : memref<512x1xi32, #tpu.memory_space<vmem>>, vector<32x1xi32>
    %141 = vector.broadcast %140 : vector<32x1xi32> to vector<32x128xi32>
    %142 = arith.cmpi eq, %141, %2 : vector<32x128xi32>
    %143 = vector.broadcast %138 : i32 to vector<32x128xi32>
    %144 = arith.addi %3, %143 : vector<32x128xi32>
    %c-1_i32_38 = arith.constant -1 : i32
    %145 = vector.broadcast %c-1_i32_38 : i32 to vector<32x128xi32>
    %146 = arith.select %142, %144, %145 : vector<32x128xi1>, vector<32x128xi32>
    %147 = arith.maxsi %136, %146 : vector<32x128xi32>
    %c13_i32 = arith.constant 13 : i32
    %c32_i32_39 = arith.constant 32 : i32
    %148 = arith.muli %c13_i32, %c32_i32_39 : i32
    %149 = tpu.assume_multiple %148, 32 : i32
    %150 = arith.index_cast %149 : i32 to index
    %c0_40 = arith.constant 0 : index
    %151 = vector.load %arg2[%150, %c0_40] : memref<512x1xi32, #tpu.memory_space<vmem>>, vector<32x1xi32>
    %152 = vector.broadcast %151 : vector<32x1xi32> to vector<32x128xi32>
    %153 = arith.cmpi eq, %152, %2 : vector<32x128xi32>
    %154 = vector.broadcast %149 : i32 to vector<32x128xi32>
    %155 = arith.addi %3, %154 : vector<32x128xi32>
    %c-1_i32_41 = arith.constant -1 : i32
    %156 = vector.broadcast %c-1_i32_41 : i32 to vector<32x128xi32>
    %157 = arith.select %153, %155, %156 : vector<32x128xi1>, vector<32x128xi32>
    %158 = arith.maxsi %147, %157 : vector<32x128xi32>
    %c14_i32 = arith.constant 14 : i32
    %c32_i32_42 = arith.constant 32 : i32
    %159 = arith.muli %c14_i32, %c32_i32_42 : i32
    %160 = tpu.assume_multiple %159, 32 : i32
    %161 = arith.index_cast %160 : i32 to index
    %c0_43 = arith.constant 0 : index
    %162 = vector.load %arg2[%161, %c0_43] : memref<512x1xi32, #tpu.memory_space<vmem>>, vector<32x1xi32>
    %163 = vector.broadcast %162 : vector<32x1xi32> to vector<32x128xi32>
    %164 = arith.cmpi eq, %163, %2 : vector<32x128xi32>
    %165 = vector.broadcast %160 : i32 to vector<32x128xi32>
    %166 = arith.addi %3, %165 : vector<32x128xi32>
    %c-1_i32_44 = arith.constant -1 : i32
    %167 = vector.broadcast %c-1_i32_44 : i32 to vector<32x128xi32>
    %168 = arith.select %164, %166, %167 : vector<32x128xi1>, vector<32x128xi32>
    %169 = arith.maxsi %158, %168 : vector<32x128xi32>
    %c15_i32 = arith.constant 15 : i32
    %c32_i32_45 = arith.constant 32 : i32
    %170 = arith.muli %c15_i32, %c32_i32_45 : i32
    %171 = tpu.assume_multiple %170, 32 : i32
    %172 = arith.index_cast %171 : i32 to index
    %c0_46 = arith.constant 0 : index
    %173 = vector.load %arg2[%172, %c0_46] : memref<512x1xi32, #tpu.memory_space<vmem>>, vector<32x1xi32>
    %174 = vector.broadcast %173 : vector<32x1xi32> to vector<32x128xi32>
    %175 = arith.cmpi eq, %174, %2 : vector<32x128xi32>
    %176 = vector.broadcast %171 : i32 to vector<32x128xi32>
    %177 = arith.addi %3, %176 : vector<32x128xi32>
    %c-1_i32_47 = arith.constant -1 : i32
    %178 = vector.broadcast %c-1_i32_47 : i32 to vector<32x128xi32>
    %179 = arith.select %175, %177, %178 : vector<32x128xi1>, vector<32x128xi32>
    %180 = arith.maxsi %169, %179 : vector<32x128xi32>
    %c16_i32 = arith.constant 16 : i32
    %cst = arith.constant dense<-2147483648> : vector<128xi32>
    %181 = vector.multi_reduction <maxsi>, %180, %cst [0] : vector<32x128xi32> to vector<128xi32>
    %182 = vector.shape_cast %181 : vector<128xi32> to vector<1x128xi32>
    %c0_i32_48 = arith.constant 0 : i32
    %183 = vector.broadcast %c0_i32_48 : i32 to vector<1x128xi32>
    %184 = arith.cmpi sge, %182, %183 : vector<1x128xi32>
    %c1_i32_49 = arith.constant 1 : i32
    %185 = vector.broadcast %c1_i32_49 : i32 to vector<1x128xi32>
    %186 = arith.select %184, %182, %185 : vector<1x128xi1>, vector<1x128xi32>
    %c0_50 = arith.constant 0 : index
    %c0_51 = arith.constant 0 : index
    %187 = vector.load %arg3[%c0_50, %c0_51] : memref<1x128xi32, #tpu.memory_space<vmem>>, vector<1x128xi32>
    tpu.vector_store %arg3[%c0_50, %c0_51], %186 {strides = array<i32>} : memref<1x128xi32, #tpu.memory_space<vmem>>, vector<1x128xi32>,
    return
  }
  func.func @transform_0(%arg0: i32) -> (i32, i32) {
    %c0_i32 = arith.constant 0 : i32
    %c0_i32_0 = arith.constant 0 : i32
    return %c0_i32, %arg0 : i32, i32
  }
  func.func @transform_1(%arg0: i32) -> (i32, i32) {
    %c0_i32 = arith.constant 0 : i32
    %c0_i32_0 = arith.constant 0 : i32
    %c0_i32_1 = arith.constant 0 : i32
    return %c0_i32, %c0_i32_0 : i32, i32
  }
  func.func @transform_2(%arg0: i32) -> (i32, i32) {
    %c0_i32 = arith.constant 0 : i32
    %c0_i32_0 = arith.constant 0 : i32
    return %c0_i32, %arg0 : i32, i32
  }
}

</mosaic_0001>

<bundles_post_ra>
// kernel: tpu_custom_call.1
= control target key start
LH: loop header
LB: loop body
LE: loop exit
PB: predicated region body
PF: predicated region fallthrough
CT: control target
= control target key end

     0   :  { %v750_v2 = vmov 0   ;;  %s1246_s0 = inlined_call_operand.vmem [shape: s32[1,128], index: 0, kind: input, shape index: {}]   ;;  %s1247_s1 = inlined_call_operand.vmem [shape: s32[512,1], index: 1, kind: input, shape index: {}]   ;;  %s1248_s2 = inlined_call_operand.hbm [shape: s32[1,128], index: 2, kind: output, shape index: {}]  }
   0x1   :  { %v24_v0 = vld [vmem:[%s1247_s1 + $0x10] sm:$0xff]  ;;  %v22_v1 = vld [vmem:[%s1247_s1] sm:$0xff]  ;;  %725 = vset.pattern.permute.xlu1 %v750_v2  ;;  %724 = vset.pattern.permute.xlu0 %v750_v2  ;;  %v25_v3 = vld [vmem:[%s1247_s1 + $0x18] sm:$0xff] }
   0x2   :  { %33 = vperm.xlu1 %725, %v24_v0   ;;  %27 = vperm.xlu0 %724, %v22_v1   ;;  %v23_v4 = vld [vmem:[%s1247_s1 + $0x8] sm:$0xff]  ;;  %v662_v6 = vld [vmem:[%s1247_s1 + $0x20] sm:$0xff]  ;;  %v665_v7 = vld [vmem:[%s1247_s1 + $0x38] sm:$0xff] }
   0x3   :  { %v663_v5 = vld [vmem:[%s1247_s1 + $0x28] sm:$0xff]  ;;  %v664_v8 = vld [vmem:[%s1247_s1 + $0x30] sm:$0xff]  ;;  %v666_v10 = vld [vmem:[%s1247_s1 + $0x40] sm:$0xff] }
   0x4   :  { %v667_v9 = vld [vmem:[%s1247_s1 + $0x48] sm:$0xff]  ;;  %v669_v11 = vld [vmem:[%s1247_s1 + $0x58] sm:$0xff]  ;;  %v668_v12 = vld [vmem:[%s1247_s1 + $0x50] sm:$0xff] }
   0x6   :  { %36 = vperm.xlu1 %725, %v25_v3   ;;  %30 = vperm.xlu0 %724, %v23_v4  }
   0xa   :  { %68 = vperm.xlu1 %725, %v663_v5   ;;  %65 = vperm.xlu0 %724, %v662_v6  }
   0xe   :  { %74 = vperm.xlu1 %725, %v665_v7   ;;  %71 = vperm.xlu0 %724, %v664_v8  }
  0x12   :  { %106 = vperm.xlu1 %725, %v667_v9   ;;  %103 = vperm.xlu0 %724, %v666_v10  }
  0x16   :  { %112 = vperm.xlu1 %725, %v669_v11   ;;  %109 = vperm.xlu0 %724, %v668_v12  }
  0x17   :  { %7 = vsyncpa [#allocation3], 0  ;;  %v671_v13 = vld [vmem:[%s1247_s1 + $0x68] sm:$0xff]  ;;  %v670_v14 = vld [vmem:[%s1247_s1 + $0x60] sm:$0xff]  ;;  %v17_v1 = vlaneseq }
  0x18   :  { %v673_v15 = vld [vmem:[%s1247_s1 + $0x78] sm:$0xff]  ;;  %v672_v16 = vld [vmem:[%s1247_s1 + $0x70] sm:$0xff]  ;;  %v675_v17 = vld [vmem:[%s1247_s1 + $0x88] sm:$0xff] }
  0x19   :  { %v674_v18 = vld [vmem:[%s1247_s1 + $0x80] sm:$0xff]  ;;  %v677_v19 = vld [vmem:[%s1247_s1 + $0x98] sm:$0xff]  ;;  %v676_v20 = vld [vmem:[%s1247_s1 + $0x90] sm:$0xff]  ;;  %v964_v4 = vshrl.u32 %v17_v1, 7 }
  0x1a   :  { %144 = vperm.xlu1 %725, %v671_v13   ;;  %141 = vperm.xlu0 %724, %v670_v14   ;;  %v679_v21 = vld [vmem:[%s1247_s1 + $0xa8] sm:$0xff]  ;;  %v678_v22 = vld [vmem:[%s1247_s1 + $0xa0] sm:$0xff]  ;;  %v681_v23 = vld [vmem:[%s1247_s1 + $0xb8] sm:$0xff] }
  0x1b   :  { %v680_v24 = vld [vmem:[%s1247_s1 + $0xb0] sm:$0xff]  ;;  %v683_v25 = vld [vmem:[%s1247_s1 + $0xc8] sm:$0xff]  ;;  %v682_v26 = vld [vmem:[%s1247_s1 + $0xc0] sm:$0xff]  ;;  %v968_v6 = vadd.s32 8, %v964_v4  ;;  %v971_v7 = vadd.s32 16, %v964_v4  ;;  %v975_v10 = vadd.s32 24, %v964_v4 }
  0x1c   :  { %v685_v27 = vld [vmem:[%s1247_s1 + $0xd8] sm:$0xff]  ;;  %v684_v28 = vld [vmem:[%s1247_s1 + $0xd0] sm:$0xff]  ;;  %v687_v29 = vld [vmem:[%s1247_s1 + $0xe8] sm:$0xff]  ;;  %v81_v14 = vadd.s32 32, %v964_v4 }
  0x1d   :  { %v686_v30 = vld [vmem:[%s1247_s1 + $0xe0] sm:$0xff]  ;;  %v689_v31 = vld [vmem:[%s1247_s1 + $0xf8] sm:$0xff]  ;;  %v688_v32 = vld [vmem:[%s1247_s1 + $0xf0] sm:$0xff]  ;;  %v82_v13 = vadd.s32 32, %v968_v6  ;;  %v196_v1 = vadd.s32 128, %v968_v6 }
  0x1e   :  { %150 = vperm.xlu1 %725, %v673_v15   ;;  %147 = vperm.xlu0 %724, %v672_v16   ;;  %v691_v33 = vld [vmem:[%s1247_s1 + $0x108] sm:$0xff]  ;;  %v690_v34 = vld [vmem:[%s1247_s1 + $0x100] sm:$0xff]  ;;  %v693_v35 = vld [vmem:[%s1247_s1 + $0x118] sm:$0xff] }
  0x1f   :  { %v692_v36 = vld [vmem:[%s1247_s1 + $0x110] sm:$0xff]  ;;  %v695_v37 = vld [vmem:[%s1247_s1 + $0x128] sm:$0xff]  ;;  %v694_v38 = vld [vmem:[%s1247_s1 + $0x120] sm:$0xff] }
  0x20   :  { %v697_v39 = vld [vmem:[%s1247_s1 + $0x138] sm:$0xff]  ;;  %v696_v40 = vld [vmem:[%s1247_s1 + $0x130] sm:$0xff]  ;;  %v699_v41 = vld [vmem:[%s1247_s1 + $0x148] sm:$0xff] }
  0x21   :  { %v698_v42 = vld [vmem:[%s1247_s1 + $0x140] sm:$0xff]  ;;  %v701_v43 = vld [vmem:[%s1247_s1 + $0x158] sm:$0xff]  ;;  %v700_v44 = vld [vmem:[%s1247_s1 + $0x150] sm:$0xff] }
  0x22   :  { %182 = vperm.xlu1 %725, %v675_v17   ;;  %179 = vperm.xlu0 %724, %v674_v18   ;;  %v703_v45 = vld [vmem:[%s1247_s1 + $0x168] sm:$0xff]  ;;  %v702_v46 = vld [vmem:[%s1247_s1 + $0x160] sm:$0xff]  ;;  %v705_v47 = vld [vmem:[%s1247_s1 + $0x178] sm:$0xff] }
  0x23   :  { %v704_v48 = vld [vmem:[%s1247_s1 + $0x170] sm:$0xff]  ;;  %v707_v49 = vld [vmem:[%s1247_s1 + $0x188] sm:$0xff]  ;;  %v706_v50 = vld [vmem:[%s1247_s1 + $0x180] sm:$0xff] }
  0x24   :  { %v709_v51 = vld [vmem:[%s1247_s1 + $0x198] sm:$0xff]  ;;  %v708_v52 = vld [vmem:[%s1247_s1 + $0x190] sm:$0xff]  ;;  %v711_v53 = vld [vmem:[%s1247_s1 + $0x1a8] sm:$0xff] }
  0x25   :  { %v710_v54 = vld [vmem:[%s1247_s1 + $0x1a0] sm:$0xff]  ;;  %v713_v55 = vld [vmem:[%s1247_s1 + $0x1b8] sm:$0xff]  ;;  %v712_v56 = vld [vmem:[%s1247_s1 + $0x1b0] sm:$0xff] }
  0x26   :  { %188 = vperm.xlu1 %725, %v677_v19   ;;  %185 = vperm.xlu0 %724, %v676_v20   ;;  %v715_v57 = vld [vmem:[%s1247_s1 + $0x1c8] sm:$0xff]  ;;  %v714_v58 = vld [vmem:[%s1247_s1 + $0x1c0] sm:$0xff]  ;;  %v717_v59 = vld [vmem:[%s1247_s1 + $0x1d8] sm:$0xff]  ;;  %v84_v19 = vadd.s32 32, %v975_v10  ;;  %v83_v20 = vadd.s32 32, %v971_v7 }
  0x27   :  { %v716_v60 = vld [vmem:[%s1247_s1 + $0x1d0] sm:$0xff]  ;;  %v719_v61 = vld [vmem:[%s1247_s1 + $0x1e8] sm:$0xff]  ;;  %v718_v62 = vld [vmem:[%s1247_s1 + $0x1e0] sm:$0xff] }
  0x28   :  { %v721_v63 = vld [vmem:[%s1247_s1 + $0x1f8] sm:$0xff]  ;;  %v720_v0 = vld [vmem:[%s1247_s1 + $0x1f0] sm:$0xff]  ;;  %v962_v2 = vld [vmem:[%s1246_s0] ss:$0 sm:$0xff]  ;;  %s751_s0 = smov [#allocation2]  }
  0x29   :  { %s653_s1 = sshll.u32 %s751_s0, 4  ;;  %s654_s1 = int_to_ptr.vmem [resolvable:$true] %s653_s1 }
  0x2a   :  { %220 = vperm.xlu1 %725, %v679_v21   ;;  %217 = vperm.xlu0 %724, %v678_v22   ;;  %s726_s27 = scalar_lea.vmem %s654_s1, 16  ;;  %s730_s28 = scalar_lea.vmem %s654_s1, 32 }
  0x2b   :  { %p727_p0 = scmp.ne.s32.totalorder %s654_s1, %s726_s27  ;;  %p731_p1 = scmp.lt.s32.totalorder %s654_s1, %s654_s1 }
  0x2c   :  { %p732_p2 = scmp.lt.s32.totalorder %s730_s28, %s726_s27 }
  0x2e   :  { %226 = vperm.xlu1 %725, %v681_v23   ;;  %223 = vperm.xlu0 %724, %v680_v24   ;;  %p733_p3 = por %p732_p2, %p731_p1 }
  0x30   :  { %p734_p4 = pnand %p733_p3, %p727_p0 }
  0x32   :  { %258 = vperm.xlu1 %725, %v683_v25   ;;  %255 = vperm.xlu0 %724, %v682_v26  }
  0x36   :  { %264 = vperm.xlu1 %725, %v685_v27   ;;  %261 = vperm.xlu0 %724, %v684_v28  }
  0x3a   :  { %296 = vperm.xlu1 %725, %v687_v29   ;;  %293 = vperm.xlu0 %724, %v686_v30   ;;  %v120_v29 = vadd.s32 64, %v968_v6  ;;  %v119_v30 = vadd.s32 64, %v964_v4 }
  0x3e   :  { %302 = vperm.xlu1 %725, %v689_v31   ;;  %299 = vperm.xlu0 %724, %v688_v32  }
  0x42   :  { %334 = vperm.xlu1 %725, %v691_v33   ;;  %331 = vperm.xlu0 %724, %v690_v34  }
  0x46   :  { %340 = vperm.xlu1 %725, %v693_v35   ;;  %337 = vperm.xlu0 %724, %v692_v36  }
  0x4a   :  { %372 = vperm.xlu1 %725, %v695_v37   ;;  %369 = vperm.xlu0 %724, %v694_v38  }
  0x4e   :  { %378 = vperm.xlu1 %725, %v697_v39   ;;  %375 = vperm.xlu0 %724, %v696_v40  }
  0x52   :  { %410 = vperm.xlu1 %725, %v699_v41   ;;  %407 = vperm.xlu0 %724, %v698_v42   ;;  %v122_v41 = vadd.s32 64, %v975_v10  ;;  %v121_v42 = vadd.s32 64, %v971_v7 }
  0x56   :  { %416 = vperm.xlu1 %725, %v701_v43   ;;  %413 = vperm.xlu0 %724, %v700_v44  }
  0x5a   :  { %448 = vperm.xlu1 %725, %v703_v45   ;;  %445 = vperm.xlu0 %724, %v702_v46  }
  0x5e   :  { %454 = vperm.xlu1 %725, %v705_v47   ;;  %451 = vperm.xlu0 %724, %v704_v48  }
  0x62   :  { %486 = vperm.xlu1 %725, %v707_v49   ;;  %483 = vperm.xlu0 %724, %v706_v50   ;;  %v158_v49 = vadd.s32 96, %v968_v6  ;;  %v157_v50 = vadd.s32 96, %v964_v4 }
  0x66   :  { %492 = vperm.xlu1 %725, %v709_v51   ;;  %489 = vperm.xlu0 %724, %v708_v52  }
  0x6a   :  { %524 = vperm.xlu1 %725, %v711_v53   ;;  %521 = vperm.xlu0 %724, %v710_v54  }
  0x6e   :  { %530 = vperm.xlu1 %725, %v713_v55   ;;  %527 = vperm.xlu0 %724, %v712_v56  }
  0x72   :  { %562 = vperm.xlu1 %725, %v715_v57   ;;  %559 = vperm.xlu0 %724, %v714_v58   ;;  %v160_v57 = vadd.s32 96, %v975_v10  ;;  %v159_v58 = vadd.s32 96, %v971_v7 }
  0x76   :  { %568 = vperm.xlu1 %725, %v717_v59   ;;  %565 = vperm.xlu0 %724, %v716_v60  }
  0x7a   :  { %600 = vperm.xlu1 %725, %v719_v61   ;;  %597 = vperm.xlu0 %724, %v718_v62  }
  0x7e   :  { %606 = vperm.xlu1 %725, %v721_v63   ;;  %603 = vperm.xlu0 %724, %v720_v0  }
  0x81   :  { %v34_v3 = vpop.permute.xlu1 %33  ;;  %v28_v5 = vpop.permute.xlu0 %27 }
  0x82   :  { %vm38_vm0 = vcmp.eq.s32.totalorder %v28_v5, %v962_v2  ;;  %vm40_vm1 = vcmp.eq.s32.totalorder %v34_v3, %v962_v2  ;;  %v195_v3 = vadd.s32 128, %v964_v4 }
  0x83   :  { %v47_v8 = vsel %vm38_vm0, %v964_v4, 4294967295  ;;  %v49_v15 = vsel %vm40_vm1, %v971_v7, 4294967295 }
  0x84   :  { %vm51_vm4 = vcmp.gt.s32.totalorder %v47_v8, 4294967295  ;;  %vm55_vm8 = vcmp.gt.s32.totalorder %v49_v15, 4294967295 }
  0x85   :  { %v37_v9 = vpop.permute.xlu1 %36  ;;  %v31_v11 = vpop.permute.xlu0 %30  ;;  %v52_v21 = vsel %vm51_vm4, %v47_v8, 4294967295  ;;  %v56_v31 = vsel %vm55_vm8, %v49_v15, 4294967295  ;;  %v197_v15 = vadd.s32 128, %v971_v7 }
  0x86   :  { %vm41_vm2 = vcmp.eq.s32.totalorder %v37_v9, %v962_v2  ;;  %vm39_vm3 = vcmp.eq.s32.totalorder %v31_v11, %v962_v2 }
  0x87   :  { %v48_v12 = vsel %vm39_vm3, %v968_v6, 4294967295  ;;  %v50_v16 = vsel %vm41_vm2, %v975_v10, 4294967295 }
  0x88   :  { %vm53_vm5 = vcmp.gt.s32.totalorder %v48_v12, 4294967295  ;;  %vm57_vm9 = vcmp.gt.s32.totalorder %v50_v16, 4294967295 }
  0x89   :  { %v69_v17 = vpop.permute.xlu1 %68  ;;  %v66_v18 = vpop.permute.xlu0 %65  ;;  %v54_v22 = vsel %vm53_vm5, %v48_v12, 4294967295  ;;  %v58_v32 = vsel %vm57_vm9, %v50_v16, 4294967295 }
  0x8a   :  { %vm77_vm6 = vcmp.eq.s32.totalorder %v69_v17, %v962_v2  ;;  %vm76_vm7 = vcmp.eq.s32.totalorder %v66_v18, %v962_v2 }
  0x8b   :  { %v86_v23 = vsel %vm77_vm6, %v82_v13, 4294967295  ;;  %v85_v24 = vsel %vm76_vm7, %v81_v14, 4294967295  ;;  %v198_v14 = vadd.s32 128, %v975_v10 }
  0x8c   :  { %vm91_vm10 = vcmp.gt.s32.totalorder %v54_v22, %v86_v23  ;;  %vm89_vm11 = vcmp.gt.s32.totalorder %v52_v21, %v85_v24 }
  0x8d   :  { %v75_v25 = vpop.permute.xlu1 %74  ;;  %v72_v26 = vpop.permute.xlu0 %71  ;;  %v92_v27 = vsel %vm91_vm10, %v54_v22, %v86_v23  ;;  %v90_v28 = vsel %vm89_vm11, %v52_v21, %v85_v24  ;;  %v234_v22 = vadd.s32 160, %v968_v6  ;;  %v233_v23 = vadd.s32 160, %v964_v4 }
  0x8e   :  { %vm79_vm12 = vcmp.eq.s32.totalorder %v75_v25, %v962_v2  ;;  %vm78_vm13 = vcmp.eq.s32.totalorder %v72_v26, %v962_v2 }
  0x8f   :  { %v88_v33 = vsel %vm79_vm12, %v84_v19, 4294967295  ;;  %v87_v34 = vsel %vm78_vm13, %v83_v20, 4294967295 }
  0x90   :  { %vm95_vm14 = vcmp.gt.s32.totalorder %v58_v32, %v88_v33  ;;  %vm93_vm15 = vcmp.gt.s32.totalorder %v56_v31, %v87_v34 }
  0x91   :  { %v107_v35 = vpop.permute.xlu1 %106  ;;  %v104_v36 = vpop.permute.xlu0 %103  ;;  %v96_v37 = vsel %vm95_vm14, %v58_v32, %v88_v33  ;;  %v94_v38 = vsel %vm93_vm15, %v56_v31, %v87_v34 }
  0x92   :  { %vm115_vm0 = vcmp.eq.s32.totalorder %v107_v35, %v962_v2  ;;  %vm114_vm1 = vcmp.eq.s32.totalorder %v104_v36, %v962_v2 }
  0x93   :  { %v124_v39 = vsel %vm115_vm0, %v120_v29, 4294967295  ;;  %v123_v40 = vsel %vm114_vm1, %v119_v30, 4294967295 }
  0x94   :  { %vm129_vm2 = vcmp.gt.s32.totalorder %v92_v27, %v124_v39  ;;  %vm127_vm3 = vcmp.gt.s32.totalorder %v90_v28, %v123_v40 }
  0x95   :  { %v113_v43 = vpop.permute.xlu1 %112  ;;  %v110_v44 = vpop.permute.xlu0 %109  ;;  %v130_v45 = vsel %vm129_vm2, %v92_v27, %v124_v39  ;;  %v128_v46 = vsel %vm127_vm3, %v90_v28, %v123_v40 }
  0x96   :  { %vm117_vm4 = vcmp.eq.s32.totalorder %v113_v43, %v962_v2  ;;  %vm116_vm5 = vcmp.eq.s32.totalorder %v110_v44, %v962_v2 }
  0x97   :  { %v126_v47 = vsel %vm117_vm4, %v122_v41, 4294967295  ;;  %v125_v48 = vsel %vm116_vm5, %v121_v42, 4294967295 }
  0x98   :  { %vm133_vm6 = vcmp.gt.s32.totalorder %v96_v37, %v126_v47  ;;  %vm131_vm7 = vcmp.gt.s32.totalorder %v94_v38, %v125_v48 }
  0x99   :  { %v145_v51 = vpop.permute.xlu1 %144  ;;  %v142_v52 = vpop.permute.xlu0 %141  ;;  %v134_v53 = vsel %vm133_vm6, %v96_v37, %v126_v47  ;;  %v132_v54 = vsel %vm131_vm7, %v94_v38, %v125_v48  ;;  %v236_v48 = vadd.s32 160, %v975_v10 }
  0x9a   :  { %vm153_vm8 = vcmp.eq.s32.totalorder %v145_v51, %v962_v2  ;;  %vm152_vm9 = vcmp.eq.s32.totalorder %v142_v52, %v962_v2  ;;  %v271_v51 = vadd.s32 192, %v964_v4  ;;  %v274_v52 = vadd.s32 192, %v975_v10 }
  0x9b   :  { %v162_v55 = vsel %vm153_vm8, %v158_v49, 4294967295  ;;  %v161_v56 = vsel %vm152_vm9, %v157_v50, 4294967295  ;;  %v235_v49 = vadd.s32 160, %v971_v7  ;;  %v272_v50 = vadd.s32 192, %v968_v6 }
  0x9c   :  { %vm167_vm10 = vcmp.gt.s32.totalorder %v130_v45, %v162_v55  ;;  %vm165_vm11 = vcmp.gt.s32.totalorder %v128_v46, %v161_v56 }
  0x9d   :  { %v151_v59 = vpop.permute.xlu1 %150  ;;  %v148_v60 = vpop.permute.xlu0 %147  ;;  %v168_v61 = vsel %vm167_vm10, %v130_v45, %v162_v55  ;;  %v166_v62 = vsel %vm165_vm11, %v128_v46, %v161_v56  ;;  %v309_v55 = vadd.s32 224, %v964_v4  ;;  %v312_v56 = vadd.s32 224, %v975_v10 }
  0x9e   :  { %vm155_vm12 = vcmp.eq.s32.totalorder %v151_v59, %v962_v2  ;;  %vm154_vm13 = vcmp.eq.s32.totalorder %v148_v60, %v962_v2  ;;  %v1062_v59 = vadd.s32 256, %v964_v4 }
  0x9f   :  { %v164_v63 = vsel %vm155_vm12, %v160_v57, 4294967295  ;;  %v163_v0 = vsel %vm154_vm13, %v159_v58, 4294967295  ;;  %v311_v57 = vadd.s32 224, %v971_v7  ;;  %v1059_v58 = vadd.s32 256, %v968_v6 }
  0xa0   :  { %vm171_vm14 = vcmp.gt.s32.totalorder %v134_v53, %v164_v63  ;;  %vm169_vm15 = vcmp.gt.s32.totalorder %v132_v54, %v163_v0 }
  0xa1   :  { %v183_v5 = vpop.permute.xlu1 %182  ;;  %v180_v8 = vpop.permute.xlu0 %179  ;;  %v172_v9 = vsel %vm171_vm14, %v134_v53, %v164_v63  ;;  %v170_v11 = vsel %vm169_vm15, %v132_v54, %v163_v0  ;;  %v273_v53 = vadd.s32 192, %v971_v7  ;;  %v310_v54 = vadd.s32 224, %v968_v6 }
  0xa2   :  { %vm191_vm0 = vcmp.eq.s32.totalorder %v183_v5, %v962_v2  ;;  %vm190_vm1 = vcmp.eq.s32.totalorder %v180_v8, %v962_v2  ;;  %v1074_v63 = vadd.s32 256, %v971_v7  ;;  %v1085_v5 = vadd.s32 288, %v975_v10 }
  0xa3   :  { %v200_v12 = vsel %vm191_vm0, %v196_v1, 4294967295  ;;  %v199_v13 = vsel %vm190_vm1, %v195_v3, 4294967295  ;;  %v1078_v1 = vadd.s32 288, %v968_v6  ;;  %v1081_v3 = vadd.s32 288, %v964_v4 }
  0xa4   :  { %vm205_vm2 = vcmp.gt.s32.totalorder %v168_v61, %v200_v12  ;;  %vm203_vm3 = vcmp.gt.s32.totalorder %v166_v62, %v199_v13  ;;  %v1088_v8 = vadd.s32 288, %v971_v7 }
  0xa5   :  { %v189_v16 = vpop.permute.xlu1 %188  ;;  %v186_v17 = vpop.permute.xlu0 %185  ;;  %v206_v18 = vsel %vm205_vm2, %v168_v61, %v200_v12  ;;  %v204_v19 = vsel %vm203_vm3, %v166_v62, %v199_v13  ;;  %v1071_v62 = vadd.s32 256, %v975_v10 }
  0xa6   :  { %vm193_vm4 = vcmp.eq.s32.totalorder %v189_v16, %v962_v2  ;;  %vm192_vm5 = vcmp.eq.s32.totalorder %v186_v17, %v962_v2  ;;  %v1101_v16 = vadd.s32 320, %v975_v10 }
  0xa7   :  { %v202_v20 = vsel %vm193_vm4, %v198_v14, 4294967295  ;;  %v201_v21 = vsel %vm192_vm5, %v197_v15, 4294967295  ;;  %v1098_v15 = vadd.s32 320, %v964_v4 }
  0xa8   :  { %vm209_vm6 = vcmp.gt.s32.totalorder %v172_v9, %v202_v20  ;;  %vm207_vm7 = vcmp.gt.s32.totalorder %v170_v11, %v201_v21 }
  0xa9   :  { %v221_v24 = vpop.permute.xlu1 %220  ;;  %v218_v25 = vpop.permute.xlu0 %217  ;;  %v1017_v26 = vsel %vm209_vm6, %v172_v9, %v202_v20  ;;  %v1019_v27 = vsel %vm207_vm7, %v170_v11, %v201_v21  ;;  %v1091_v9 = vadd.s32 320, %v968_v6  ;;  %v1111_v20 = vadd.s32 352, %v968_v6 }
  0xaa   :  { %vm229_vm8 = vcmp.eq.s32.totalorder %v221_v24, %v962_v2  ;;  %vm228_vm9 = vcmp.eq.s32.totalorder %v218_v25, %v962_v2  ;;  %v1114_v21 = vadd.s32 352, %v964_v4 }
  0xab   :  { %v238_v28 = vsel %vm229_vm8, %v234_v22, 4294967295  ;;  %v237_v29 = vsel %vm228_vm9, %v233_v23, 4294967295 }
  0xac   :  { %vm243_vm10 = vcmp.gt.s32.totalorder %v206_v18, %v238_v28  ;;  %vm241_vm11 = vcmp.gt.s32.totalorder %v204_v19, %v237_v29 }
  0xad   :  { %v227_v30 = vpop.permute.xlu1 %226  ;;  %v224_v31 = vpop.permute.xlu0 %223  ;;  %v1023_v32 = vsel %vm243_vm10, %v206_v18, %v238_v28  ;;  %v1025_v33 = vsel %vm241_vm11, %v204_v19, %v237_v29  ;;  %v1106_v18 = vadd.s32 320, %v971_v7  ;;  %v1129_v28 = vadd.s32 352, %v975_v10 }
  0xae   :  { %vm231_vm12 = vcmp.eq.s32.totalorder %v227_v30, %v962_v2  ;;  %vm230_vm13 = vcmp.eq.s32.totalorder %v224_v31, %v962_v2  ;;  %v1134_v30 = vadd.s32 352, %v971_v7 }
  0xaf   :  { %v240_v0 = vsel %vm231_vm12, %v236_v48, 4294967295  ;;  %v239_v11 = vsel %vm230_vm13, %v235_v49, 4294967295 }
  0xb0   :  { %vm247_vm1 = vcmp.gt.s32.totalorder %v1017_v26, %v240_v0  ;;  %vm245_vm4 = vcmp.gt.s32.totalorder %v1019_v27, %v239_v11 }
  0xb1   :  { %v259_v34 = vpop.permute.xlu1 %258  ;;  %v256_v35 = vpop.permute.xlu0 %255  ;;  %v248_v22 = vsel %vm247_vm1, %v1017_v26, %v240_v0  ;;  %v246_v31 = vsel %vm245_vm4, %v1019_v27, %v239_v11  ;;  %v538_v0 = vadd.s32 416, %v968_v6 }
  0xb2   :  { %vm267_vm14 = vcmp.eq.s32.totalorder %v259_v34, %v962_v2  ;;  %vm266_vm15 = vcmp.eq.s32.totalorder %v256_v35, %v962_v2 }
  0xb3   :  { %v276_v12 = vsel %vm267_vm14, %v272_v50, 4294967295  ;;  %v275_v17 = vsel %vm266_vm15, %v271_v51, 4294967295 }
  0xb4   :  { %vm281_vm5 = vcmp.gt.s32.totalorder %v1023_v32, %v276_v12  ;;  %vm279_vm8 = vcmp.gt.s32.totalorder %v1025_v33, %v275_v17 }
  0xb5   :  { %v265_v36 = vpop.permute.xlu1 %264  ;;  %v262_v37 = vpop.permute.xlu0 %261  ;;  %v282_v26 = vsel %vm281_vm5, %v1023_v32, %v276_v12  ;;  %v537_v12 = vadd.s32 416, %v964_v4 }
  0xb6   :  { %vm269_vm0 = vcmp.eq.s32.totalorder %v265_v36, %v962_v2  ;;  %vm268_vm2 = vcmp.eq.s32.totalorder %v262_v37, %v962_v2  ;;  %v280_v36 = vsel %vm279_vm8, %v1025_v33, %v275_v17  ;;  %v1152_v33 = vadd.s32 384, %v968_v6 }
  0xb7   :  { %v278_v19 = vsel %vm269_vm0, %v274_v52, 4294967295  ;;  %v277_v23 = vsel %vm268_vm2, %v273_v53, 4294967295  ;;  %v1171_v53 = vadd.s32 384, %v975_v10 }
  0xb8   :  { %vm285_vm9 = vcmp.gt.s32.totalorder %v248_v22, %v278_v19  ;;  %vm283_vm11 = vcmp.gt.s32.totalorder %v246_v31, %v277_v23 }
  0xb9   :  { %v1027_v38 = vpop.permute.xlu1 %296  ;;  %v1029_v39 = vpop.permute.xlu0 %293  ;;  %v286_v37 = vsel %vm285_vm9, %v248_v22, %v278_v19 }
  0xba   :  { %vm305_vm3 = vcmp.eq.s32.totalorder %v1027_v38, %v962_v2  ;;  %vm304_vm6 = vcmp.eq.s32.totalorder %v1029_v39, %v962_v2  ;;  %v284_v39 = vsel %vm283_vm11, %v246_v31, %v277_v23  ;;  %v540_v23 = vadd.s32 416, %v975_v10 }
  0xbb   :  { %v314_v29 = vsel %vm305_vm3, %v310_v54, 4294967295  ;;  %v313_v34 = vsel %vm304_vm6, %v309_v55, 4294967295  ;;  %v1177_v54 = vadd.s32 384, %v971_v7 }
  0xbc   :  { %vm319_vm14 = vcmp.gt.s32.totalorder %v282_v26, %v314_v29  ;;  %vm317_vm0 = vcmp.gt.s32.totalorder %v280_v36, %v313_v34 }
  0xbd   :  { %v1031_v40 = vpop.permute.xlu1 %302  ;;  %v1033_v41 = vpop.permute.xlu0 %299  ;;  %v318_v48 = vsel %vm317_vm0, %v280_v36, %v313_v34 }
  0xbe   :  { %vm307_vm7 = vcmp.eq.s32.totalorder %v1031_v40, %v962_v2  ;;  %vm306_vm10 = vcmp.eq.s32.totalorder %v1033_v41, %v962_v2 }
  0xbf   :  { %v316_v35 = vsel %vm307_vm7, %v312_v56, 4294967295  ;;  %v315_v38 = vsel %vm306_vm10, %v311_v57, 4294967295 }
  0xc0   :  { %vm323_vm1 = vcmp.gt.s32.totalorder %v286_v37, %v316_v35  ;;  %vm321_vm3 = vcmp.gt.s32.totalorder %v284_v39, %v315_v38 }
  0xc1   :  { %v1035_v42 = vpop.permute.xlu1 %334  ;;  %v1037_v43 = vpop.permute.xlu0 %331  ;;  %v322_v52 = vsel %vm321_vm3, %v284_v39, %v315_v38 }
  0xc2   :  { %vm343_vm12 = vcmp.eq.s32.totalorder %v1035_v42, %v962_v2  ;;  %vm342_vm13 = vcmp.eq.s32.totalorder %v1037_v43, %v962_v2  ;;  %v1157_v42 = vadd.s32 384, %v964_v4  ;;  %v320_v43 = vsel %vm319_vm14, %v282_v26, %v314_v29 }
  0xc3   :  { %v352_v40 = vsel %vm343_vm12, %v1059_v58, 4294967295  ;;  %v351_v41 = vsel %vm342_vm13, %v1062_v59, 4294967295 }
  0xc4   :  { %vm357_vm6 = vcmp.gt.s32.totalorder %v320_v43, %v352_v40  ;;  %vm355_vm7 = vcmp.gt.s32.totalorder %v318_v48, %v351_v41 }
  0xc5   :  { %v1039_v44 = vpop.permute.xlu1 %340  ;;  %v1041_v45 = vpop.permute.xlu0 %337  ;;  %v358_v55 = vsel %vm357_vm6, %v320_v43, %v352_v40  ;;  %v356_v56 = vsel %vm355_vm7, %v318_v48, %v351_v41 }
  0xc6   :  { %vm345_vm15 = vcmp.eq.s32.totalorder %v1039_v44, %v962_v2  ;;  %vm344_vm2 = vcmp.eq.s32.totalorder %v1041_v45, %v962_v2  ;;  %v324_v45 = vsel %vm323_vm1, %v286_v37, %v316_v35 }
  0xc7   :  { %v354_v44 = vsel %vm345_vm15, %v1071_v62, 4294967295  ;;  %v353_v49 = vsel %vm344_vm2, %v1074_v63, 4294967295 }
  0xc8   :  { %vm361_vm10 = vcmp.gt.s32.totalorder %v324_v45, %v354_v44  ;;  %vm359_vm11 = vcmp.gt.s32.totalorder %v322_v52, %v353_v49 }
  0xc9   :  { %v1043_v46 = vpop.permute.xlu1 %372  ;;  %v1045_v47 = vpop.permute.xlu0 %369  ;;  %v360_v62 = vsel %vm359_vm11, %v322_v52, %v353_v49  ;;  %v578_v49 = vadd.s32 448, %v975_v10  ;;  %v577_v52 = vadd.s32 448, %v971_v7 }
  0xca   :  { %vm381_vm4 = vcmp.eq.s32.totalorder %v1043_v46, %v962_v2  ;;  %vm380_vm5 = vcmp.eq.s32.totalorder %v1045_v47, %v962_v2 }
  0xcb   :  { %v390_v46 = vsel %vm381_vm4, %v1078_v1, 4294967295  ;;  %v389_v47 = vsel %vm380_vm5, %v1081_v3, 4294967295 }
  0xcc   :  { %vm395_vm13 = vcmp.gt.s32.totalorder %v358_v55, %v390_v46  ;;  %vm393_vm0 = vcmp.gt.s32.totalorder %v356_v56, %v389_v47 }
  0xcd   :  { %v1064_v60 = vpop.permute.xlu1 %378  ;;  %v1066_v61 = vpop.permute.xlu0 %375  ;;  %v396_v1 = vsel %vm395_vm13, %v358_v55, %v390_v46 }
  0xce   :  { %vm383_vm8 = vcmp.eq.s32.totalorder %v1064_v60, %v962_v2  ;;  %vm382_vm9 = vcmp.eq.s32.totalorder %v1066_v61, %v962_v2  ;;  %v362_v61 = vsel %vm361_vm10, %v324_v45, %v354_v44 }
  0xcf   :  { %v392_v57 = vsel %vm383_vm8, %v1085_v5, 4294967295  ;;  %v391_v58 = vsel %vm382_vm9, %v1088_v8, 4294967295 }
  0xd0   :  { %vm399_vm2 = vcmp.gt.s32.totalorder %v362_v61, %v392_v57  ;;  %vm397_vm3 = vcmp.gt.s32.totalorder %v360_v62, %v391_v58 }
  0xd1   :  { %v1093_v13 = vpop.permute.xlu1 %410  ;;  %v1095_v14 = vpop.permute.xlu0 %407  ;;  %v398_v17 = vsel %vm397_vm3, %v360_v62, %v391_v58 }
  0xd2   :  { %vm419_vm12 = vcmp.eq.s32.totalorder %v1093_v13, %v962_v2  ;;  %vm418_vm14 = vcmp.eq.s32.totalorder %v1095_v14, %v962_v2  ;;  %v400_v14 = vsel %vm399_vm2, %v362_v61, %v392_v57 }
  0xd3   :  { %v428_v63 = vsel %vm419_vm12, %v1091_v9, 4294967295  ;;  %v427_v3 = vsel %vm418_vm14, %v1098_v15, 4294967295  ;;  %v394_v9 = vsel %vm393_vm0, %v356_v56, %v389_v47  ;;  %v614_v56 = vadd.s32 480, %v968_v6 }
  0xd4   :  { %vm433_vm5 = vcmp.gt.s32.totalorder %v396_v1, %v428_v63  ;;  %vm431_vm8 = vcmp.gt.s32.totalorder %v394_v9, %v427_v3 }
  0xd5   :  { %v1124_v24 = vpop.permute.xlu1 %416  ;;  %v1126_v25 = vpop.permute.xlu0 %413  ;;  %v434_v15 = vsel %vm433_vm5, %v396_v1, %v428_v63  ;;  %v615_v1 = vadd.s32 480, %v971_v7 }
  0xd6   :  { %vm421_vm15 = vcmp.eq.s32.totalorder %v1124_v24, %v962_v2  ;;  %vm420_vm1 = vcmp.eq.s32.totalorder %v1126_v25, %v962_v2  ;;  %v432_v25 = vsel %vm431_vm8, %v394_v9, %v427_v3 }
  0xd7   :  { %v430_v5 = vsel %vm421_vm15, %v1101_v16, 4294967295  ;;  %v429_v13 = vsel %vm420_vm1, %v1106_v18, 4294967295 }
  0xd8   :  { %vm437_vm9 = vcmp.gt.s32.totalorder %v400_v14, %v430_v5  ;;  %vm435_vm12 = vcmp.gt.s32.totalorder %v398_v17, %v429_v13 }
  0xd9   :  { %v1145_v27 = vpop.permute.xlu1 %448  ;;  %v1147_v32 = vpop.permute.xlu0 %445  ;;  %v438_v29 = vsel %vm437_vm9, %v400_v14, %v430_v5  ;;  %v436_v34 = vsel %vm435_vm12, %v398_v17, %v429_v13 }
  0xda   :  { %vm457_vm4 = vcmp.eq.s32.totalorder %v1145_v27, %v962_v2  ;;  %vm456_vm6 = vcmp.eq.s32.totalorder %v1147_v32, %v962_v2  ;;  %v575_v32 = vadd.s32 448, %v964_v4 }
  0xdb   :  { %v466_v19 = vsel %vm457_vm4, %v1111_v20, 4294967295  ;;  %v465_v16 = vsel %vm456_vm6, %v1114_v21, 4294967295  ;;  %v539_v20 = vadd.s32 416, %v971_v7 }
  0xdc   :  { %vm471_vm13 = vcmp.gt.s32.totalorder %v434_v15, %v466_v19  ;;  %vm469_vm15 = vcmp.gt.s32.totalorder %v432_v25, %v465_v16 }
  0xdd   :  { %v455_v50 = vpop.permute.xlu1 %454  ;;  %v452_v51 = vpop.permute.xlu0 %451  ;;  %v472_v21 = vsel %vm471_vm13, %v434_v15, %v466_v19  ;;  %v470_v37 = vsel %vm469_vm15, %v432_v25, %v465_v16 }
  0xde   :  { %vm459_vm7 = vcmp.eq.s32.totalorder %v455_v50, %v962_v2  ;;  %vm458_vm10 = vcmp.eq.s32.totalorder %v452_v51, %v962_v2 }
  0xdf   :  { %v468_v24 = vsel %vm459_vm7, %v1129_v28, 4294967295  ;;  %v467_v31 = vsel %vm458_vm10, %v1134_v30, 4294967295  ;;  %v576_v30 = vadd.s32 448, %v968_v6  ;;  %v616_v6 = vadd.s32 480, %v975_v10 }
  0xe0   :  { %vm475_vm2 = vcmp.gt.s32.totalorder %v438_v29, %v468_v24  ;;  %vm473_vm4 = vcmp.gt.s32.totalorder %v436_v34, %v467_v31 }
  0xe1   :  { %v487_v59 = vpop.permute.xlu1 %486  ;;  %v484_v60 = vpop.permute.xlu0 %483  ;;  %v474_v40 = vsel %vm473_vm4, %v436_v34, %v467_v31 }
  0xe2   :  { %vm495_vm11 = vcmp.eq.s32.totalorder %v487_v59, %v962_v2  ;;  %vm494_vm14 = vcmp.eq.s32.totalorder %v484_v60, %v962_v2  ;;  %v613_v59 = vadd.s32 480, %v964_v4 }
  0xe3   :  { %v504_v26 = vsel %vm495_vm11, %v1152_v33, 4294967295  ;;  %v503_v28 = vsel %vm494_vm14, %v1157_v42, 4294967295  ;;  %v476_v33 = vsel %vm475_vm2, %v438_v29, %v468_v24 }
  0xe4   :  { %vm509_vm5 = vcmp.gt.s32.totalorder %v472_v21, %v504_v26  ;;  %vm507_vm7 = vcmp.gt.s32.totalorder %v470_v37, %v503_v28 }
  0xe5   :  { %v493_v8 = vpop.permute.xlu1 %492  ;;  %v490_v11 = vpop.permute.xlu0 %489  ;;  %v510_v41 = vsel %vm509_vm5, %v472_v21, %v504_v26  ;;  %v508_v48 = vsel %vm507_vm7, %v470_v37, %v503_v28 }
  0xe6   :  { %vm497_vm0 = vcmp.eq.s32.totalorder %v493_v8, %v962_v2  ;;  %vm496_vm1 = vcmp.eq.s32.totalorder %v490_v11, %v962_v2 }
  0xe7   :  { %v506_v38 = vsel %vm497_vm0, %v1171_v53, 4294967295  ;;  %v505_v27 = vsel %vm496_vm1, %v1177_v54, 4294967295 }
  0xe8   :  { %vm513_vm10 = vcmp.gt.s32.totalorder %v476_v33, %v506_v38  ;;  %vm511_vm11 = vcmp.gt.s32.totalorder %v474_v40, %v505_v27 }
  0xe9   :  { %v525_v18 = vpop.permute.xlu1 %524  ;;  %v522_v22 = vpop.permute.xlu0 %521  ;;  %v514_v46 = vsel %vm513_vm10, %v476_v33, %v506_v38  ;;  %v512_v53 = vsel %vm511_vm11, %v474_v40, %v505_v27 }
  0xea   :  { %vm533_vm3 = vcmp.eq.s32.totalorder %v525_v18, %v962_v2  ;;  %vm532_vm6 = vcmp.eq.s32.totalorder %v522_v22, %v962_v2 }
  0xeb   :  { %v542_v39 = vsel %vm533_vm3, %v538_v0, 4294967295  ;;  %v541_v42 = vsel %vm532_vm6, %v537_v12, 4294967295 }
  0xec   :  { %vm547_vm14 = vcmp.gt.s32.totalorder %v510_v41, %v542_v39  ;;  %vm545_vm15 = vcmp.gt.s32.totalorder %v508_v48, %v541_v42 }
  0xed   :  { %v531_v35 = vpop.permute.xlu1 %530  ;;  %v528_v36 = vpop.permute.xlu0 %527  ;;  %v548_v57 = vsel %vm547_vm14, %v510_v41, %v542_v39  ;;  %v546_v58 = vsel %vm545_vm15, %v508_v48, %v541_v42 }
  0xee   :  { %vm535_vm8 = vcmp.eq.s32.totalorder %v531_v35, %v962_v2  ;;  %vm534_vm9 = vcmp.eq.s32.totalorder %v528_v36, %v962_v2 }
  0xef   :  { %v544_v45 = vsel %vm535_vm8, %v540_v23, 4294967295  ;;  %v543_v50 = vsel %vm534_vm9, %v539_v20, 4294967295 }
  0xf0   :  { %vm551_vm0 = vcmp.gt.s32.totalorder %v514_v46, %v544_v45  ;;  %vm549_vm3 = vcmp.gt.s32.totalorder %v512_v53, %v543_v50 }
  0xf1   :  { %v563_v43 = vpop.permute.xlu1 %562  ;;  %v560_v44 = vpop.permute.xlu0 %559  ;;  %v552_v61 = vsel %vm551_vm0, %v514_v46, %v544_v45  ;;  %v550_v3 = vsel %vm549_vm3, %v512_v53, %v543_v50 }
  0xf2   :  { %vm571_vm12 = vcmp.eq.s32.totalorder %v563_v43, %v962_v2  ;;  %vm570_vm13 = vcmp.eq.s32.totalorder %v560_v44, %v962_v2 }
  0xf3   :  { %v580_v51 = vsel %vm571_vm12, %v576_v30, 4294967295  ;;  %v579_v47 = vsel %vm570_vm13, %v575_v32, 4294967295 }
  0xf4   :  { %vm585_vm4 = vcmp.gt.s32.totalorder %v548_v57, %v580_v51  ;;  %vm583_vm5 = vcmp.gt.s32.totalorder %v546_v58, %v579_v47 }
  0xf5   :  { %v569_v54 = vpop.permute.xlu1 %568  ;;  %v566_v55 = vpop.permute.xlu0 %565  ;;  %v586_v5 = vsel %vm585_vm4, %v548_v57, %v580_v51  ;;  %v584_v11 = vsel %vm583_vm5, %v546_v58, %v579_v47 }
  0xf6   :  { %vm573_vm1 = vcmp.eq.s32.totalorder %v569_v54, %v962_v2  ;;  %vm572_vm2 = vcmp.eq.s32.totalorder %v566_v55, %v962_v2 }
  0xf7   :  { %v582_v60 = vsel %vm573_vm1, %v578_v49, 4294967295  ;;  %v581_v62 = vsel %vm572_vm2, %v577_v52, 4294967295 }
  0xf8   :  { %vm589_vm8 = vcmp.gt.s32.totalorder %v552_v61, %v582_v60  ;;  %vm587_vm9 = vcmp.gt.s32.totalorder %v550_v3, %v581_v62 }
  0xf9   :  { %v601_v63 = vpop.permute.xlu1 %600  ;;  %v598_v0 = vpop.permute.xlu0 %597  ;;  %v590_v10 = vsel %vm589_vm8, %v552_v61, %v582_v60  ;;  %v588_v19 = vsel %vm587_vm9, %v550_v3, %v581_v62 }
  0xfa   :  { %vm609_vm6 = vcmp.eq.s32.totalorder %v601_v63, %v962_v2  ;;  %vm608_vm7 = vcmp.eq.s32.totalorder %v598_v0, %v962_v2 }
  0xfb   :  { %v618_v8 = vsel %vm609_vm6, %v614_v56, 4294967295  ;;  %v617_v4 = vsel %vm608_vm7, %v613_v59, 4294967295 }
  0xfc   :  { %vm623_vm10 = vcmp.gt.s32.totalorder %v586_v5, %v618_v8  ;;  %vm621_vm11 = vcmp.gt.s32.totalorder %v584_v11, %v617_v4 }
  0xfd   :  { %v624_v12 = vsel %vm623_vm10, %v586_v5, %v618_v8  ;;  %v622_v9 = vsel %vm621_vm11, %v584_v11, %v617_v4  ;;  %v607_v13 = vpop.permute.xlu1 %606  ;;  %v604_v14 = vpop.permute.xlu0 %603 }
  0xfe   :  { %vm629_vm12 = vcmp.gt.s32.totalorder %v622_v9, %v624_v12  ;;  %vm611_vm13 = vcmp.eq.s32.totalorder %v607_v13, %v962_v2  ;;  %vm610_vm14 = vcmp.eq.s32.totalorder %v604_v14, %v962_v2 }
  0xff   :  { %v630_v7 = vsel %vm629_vm12, %v622_v9, %v624_v12  ;;  %v620_v17 = vsel %vm611_vm13, %v616_v6, 4294967295  ;;  %v619_v15 = vsel %vm610_vm14, %v615_v1, 4294967295 }
 0x100   :  { %vm627_vm15 = vcmp.gt.s32.totalorder %v590_v10, %v620_v17  ;;  %vm625_vm0 = vcmp.gt.s32.totalorder %v588_v19, %v619_v15 }
 0x101   :  { %v628_v16 = vsel %vm627_vm15, %v590_v10, %v620_v17  ;;  %v626_v18 = vsel %vm625_vm0, %v588_v19, %v619_v15 }
 0x102   :  { %vm631_vm1 = vcmp.gt.s32.totalorder %v626_v18, %v628_v16 }
 0x103   :  { %v632_v22 = vsel %vm631_vm1, %v626_v18, %v628_v16 }
 0x104   :  { %vm633_vm2 = vcmp.gt.s32.totalorder %v630_v7, %v632_v22 }
 0x105   :  { %v634_v23 = vsel %vm633_vm2, %v630_v7, %v632_v22 }
 0x106   :  { %v635_v24 = vrot.slane %v634_v23, 4 }
 0x108   :  { %vm636_vm3 = vcmp.gt.s32.totalorder %v634_v23, %v635_v24 }
 0x109   :  { %v637_v20 = vsel %vm636_vm3, %v634_v23, %v635_v24 }
 0x10a   :  { %v638_v25 = vrot.slane %v637_v20, 2 }
 0x10c   :  { %vm639_vm4 = vcmp.gt.s32.totalorder %v637_v20, %v638_v25 }
 0x10d   :  { %v640_v29 = vsel %vm639_vm4, %v637_v20, %v638_v25 }
 0x10e   :  { %v641_v31 = vrot.slane %v640_v29, 1 }
 0x110   :  { %vm642_vm5 = vcmp.gt.s32.totalorder %v640_v29, %v641_v31 }
 0x111   :  { %v643_v2 = vsel %vm642_vm5, %v640_v29, %v641_v31 }
 0x112   :  { %vm644_vm6 = vcmp.ge.s32.totalorder %v643_v2, 0 }
 0x113   :  { %v645_v26 = vsel %vm644_vm6, %v643_v2, 1 }
 0x114   :  { %646 = vst [vmem:[#allocation2] sm:$0x1] %v645_v26 }
 0x115   :  { %737 = shalt.err (!%p734_p4)
}
 0x116   :  { %s738_s3 = scalar_lea.hbm %s1248_s2, 16 }
 0x117   :  { %p739_p5 = scmp.ne.s32.totalorder %s1248_s2, %s738_s3  ;;  %p742_p6 = scmp.lt.u32.totalorder %s738_s3, %s1248_s2 }
 0x119   :  { %p744_p7 = pnand %p742_p6, %p739_p5 }
 0x11b   :  { %747 = shalt.err (!%p744_p7)
}
 0x11c   :  { %656 = dma.vmem_to_hbm [thread:$0]  %s654_s1, 16, %s1248_s2, [#allocation3]  }
 0x11d   :  { %748 = dma.done.wait [#allocation3], 16  }
 0x11e   :  { %749 = vsyncadd [#allocation3], 4294967280 }
 0x11f   :  { %660 = vsyncpa [#allocation3], 1 }

</bundles_post_ra>
